<compile_context>
chip_gen: v6e
topology: v6e:2x2x1
jax: 0.10.0
libtpu: 0.0.40
codegen_flags: <defaults>
</compile_context>

<pallas_src>
import jax
import jax.numpy as jnp
from jax.experimental import pallas as pl
from jax.experimental.pallas import tpu as pltpu

HIDDEN = 128   # hidden width fixed by the module (dense_1 / dense_2)
LANE = 128     # TPU lane width


def _round_up(x, m):
    return ((x + m - 1) // m) * m


def densenet_kernel(x_ref, w1_ref, b1_ref, w2_ref, b2_ref, w3_ref, b3_ref, o_ref):
    # x_ref: (m_tile, d_in_pad) bf16 ; w*: bf16 ; b*: f32 ; o_ref: (m_tile, d_out_pad) f32
    h1 = jnp.dot(x_ref[...], w1_ref[...],
                 preferred_element_type=jnp.float32) + b1_ref[...]
    h1 = jnp.maximum(h1, 0.0).astype(jnp.bfloat16)                       # ReLU
    h2 = jnp.dot(h1, w2_ref[...],
                 preferred_element_type=jnp.float32) + b2_ref[...]
    h2 = jnp.maximum(h2, 0.0).astype(jnp.bfloat16)                       # ReLU
    h3 = jnp.dot(h2, w3_ref[...],
                 preferred_element_type=jnp.float32) + b3_ref[...]
    o_ref[...] = jnp.tanh(h3)                                            # Tanh (lane-dense store)


def densenet_forward_many(x_many, params, input_dim, output_dim, node_num):
    """Run M independent DenseNet evaluations in ONE pallas_call.

    x_many: (M, ...) where each row flattens to input_dim*node_num features.
    Returns (M, node_num, output_dim).
    """
    w1, b1, w2, b2, w3, b3 = params
    d_in = input_dim * node_num
    d_out = node_num * output_dim
    d_in_pad = _round_up(d_in, LANE)
    d_out_pad = _round_up(d_out, LANE)

    M = x_many.shape[0]
    x_flat = x_many.reshape(M, -1)
    assert x_flat.shape[1] == d_in, "each evaluation must flatten to input_dim*node_num"

    # Row tile: 128 when there is enough work, else a sublane multiple.
    m_tile = 128 if M >= 128 else _round_up(max(M, 1), 8)
    m_pad = _round_up(M, m_tile)
    grid = (m_pad // m_tile,)

    # Pad activations/weights so everything is lane-dense (128-aligned); cast
    # matmul operands to bf16 (f32 accumulation happens in the kernel).
    x_p = jnp.zeros((m_pad, d_in_pad), jnp.bfloat16).at[:M, :d_in].set(
        x_flat.astype(jnp.bfloat16))
    w1_p = jnp.zeros((d_in_pad, HIDDEN), jnp.bfloat16).at[:d_in, :].set(
        w1.astype(jnp.bfloat16))
    w2_p = w2.astype(jnp.bfloat16)
    w3_p = jnp.zeros((HIDDEN, d_out_pad), jnp.bfloat16).at[:, :d_out].set(
        w3.astype(jnp.bfloat16))
    b1_p = b1.reshape(1, HIDDEN).astype(jnp.float32)
    b2_p = b2.reshape(1, HIDDEN).astype(jnp.float32)
    b3_p = jnp.zeros((1, d_out_pad), jnp.float32).at[:, :d_out].set(
        b3.reshape(1, d_out).astype(jnp.float32))

    flops = 2 * m_pad * (d_in_pad * HIDDEN + HIDDEN * HIDDEN + HIDDEN * d_out_pad)
    bytes_accessed = (
        x_p.size * 2 + w1_p.size * 2 + w2_p.size * 2 + w3_p.size * 2
        + (b1_p.size + b2_p.size + b3_p.size) * 4
        + m_pad * d_out_pad * 4)

    out = pl.pallas_call(
        densenet_kernel,
        out_shape=jax.ShapeDtypeStruct((m_pad, d_out_pad), jnp.float32),
        grid=grid,
        in_specs=[
            pl.BlockSpec((m_tile, d_in_pad), lambda i: (i, 0)),   # x tile (varies over grid)
            pl.BlockSpec((d_in_pad, HIDDEN), lambda i: (0, 0)),   # w1 (resident)
            pl.BlockSpec((1, HIDDEN), lambda i: (0, 0)),          # b1
            pl.BlockSpec((HIDDEN, HIDDEN), lambda i: (0, 0)),     # w2
            pl.BlockSpec((1, HIDDEN), lambda i: (0, 0)),          # b2
            pl.BlockSpec((HIDDEN, d_out_pad), lambda i: (0, 0)),  # w3 (lane-padded)
            pl.BlockSpec((1, d_out_pad), lambda i: (0, 0)),       # b3 (lane-padded)
        ],
        out_specs=pl.BlockSpec((m_tile, d_out_pad), lambda i: (i, 0)),
        compiler_params=pltpu.CompilerParams(
            dimension_semantics=("parallel",)),
        cost_estimate=pl.CostEstimate(
            flops=flops,
            transcendentals=m_pad * d_out_pad,
            bytes_accessed=bytes_accessed),
    )(x_p, w1_p, b1_p, w2_p, b2_p, w3_p, b3_p)

    return out[:M, :d_out].reshape(M, node_num, output_dim)


def densenet_forward(x, params, input_dim, output_dim, node_num):
    """Module-faithful forward: the PyTorch reshape to (node_num, output_dim)
    implies a single evaluation (batch == 1)."""
    x_flat = x.reshape(1, -1)
    y = densenet_forward_many(x_flat, params, input_dim, output_dim, node_num)
    return y[0]


def init_params(key, input_dim, output_dim, node_num):
    """Synthetic init matching nn.Linear shapes; weights stored (in, out)."""
    d_in = input_dim * node_num
    d_out = node_num * output_dim
    k1, k2, k3, k4, k5, k6 = jax.random.split(key, 6)

    def uinit(k, fan_in, shape):
        bound = 1.0 / jnp.sqrt(fan_in)
        return jax.random.uniform(k, shape, jnp.float32, -bound, bound)

    w1 = uinit(k1, d_in, (d_in, HIDDEN))
    b1 = uinit(k2, d_in, (1, HIDDEN))
    w2 = uinit(k3, HIDDEN, (HIDDEN, HIDDEN))
    b2 = uinit(k4, HIDDEN, (1, HIDDEN))
    w3 = uinit(k5, HIDDEN, (HIDDEN, d_out))
    b3 = uinit(k6, HIDDEN, (1, d_out))
    return (w1, b1, w2, b2, w3, b3)


def reference_forward_many(x_many, params):
    """Pure-JAX reference with the same bf16-input / f32-accumulate recipe."""
    w1, b1, w2, b2, w3, b3 = params
    x = x_many.reshape(x_many.shape[0], -1).astype(jnp.bfloat16)
    h1 = jnp.maximum(
        jnp.dot(x, w1.astype(jnp.bfloat16), preferred_element_type=jnp.float32) + b1, 0.0)
    h2 = jnp.maximum(
        jnp.dot(h1.astype(jnp.bfloat16), w2.astype(jnp.bfloat16),
                preferred_element_type=jnp.float32) + b2, 0.0)
    h3 = jnp.dot(h2.astype(jnp.bfloat16), w3.astype(jnp.bfloat16),
                 preferred_element_type=jnp.float32) + b3
    return jnp.tanh(h3)


if __name__ == "__main__":
    input_dim, output_dim, node_num = 4, 3, 8

    key = jax.random.PRNGKey(0)
    kx, kxs, kp = jax.random.split(key, 3)
    params = init_params(kp, input_dim, output_dim, node_num)

    # 1) Module-semantics forward (batch == 1), exactly like the PyTorch spec.
    x = jax.random.normal(kx, (1, node_num, input_dim), jnp.float32)
    y = jax.block_until_ready(
        densenet_forward(x, params, input_dim, output_dim, node_num))
    assert y.shape == (node_num, output_dim)
    ref = reference_forward_many(x.reshape(1, -1), params)[0].reshape(
        node_num, output_dim)
    assert jnp.allclose(y, ref, atol=1e-2), "single-eval mismatch vs reference"

    # 2) Amortized path: many independent DenseNet evaluations, ONE pallas_call.
    M = 8
    xs = jax.random.normal(kxs, (M, node_num, input_dim), jnp.float32)
    ys = jax.block_until_ready(
        densenet_forward_many(xs, params, input_dim, output_dim, node_num))
    refs = reference_forward_many(xs, params).reshape(M, node_num, output_dim)
    assert ys.shape == (M, node_num, output_dim)
    assert jnp.allclose(ys, refs, atol=1e-2), "batched mismatch vs reference"

    print("KERNEL_OK")
</pallas_src>

<mosaic_0001>
module attributes {stable_mosaic.version = 11 : i64} {
  func.func @densenet_kernel(%arg0: i32, %arg1: memref<8x128xbf16, #tpu.memory_space<vmem>>, %arg2: memref<128x128xbf16, #tpu.memory_space<vmem>>, %arg3: memref<1x128xf32, #tpu.memory_space<vmem>>, %arg4: memref<128x128xbf16, #tpu.memory_space<vmem>>, %arg5: memref<1x128xf32, #tpu.memory_space<vmem>>, %arg6: memref<128x128xbf16, #tpu.memory_space<vmem>>, %arg7: memref<1x128xf32, #tpu.memory_space<vmem>>, %arg8: memref<8x128xf32, #tpu.memory_space<vmem>>) attributes {dimension_semantics = [#tpu.dimension_semantics<parallel>], iteration_bounds = array<i64: 1>, scalar_prefetch = 0 : i64, scratch_operands = 0 : i64, tpu.core_type = #tpu.core_type<tc>, window_params = [{transform_indices = @transform_0, window_bounds = array<i64: 8, 128>}, {pipeline_mode = #tpu.pipeline_mode<synchronous>, transform_indices = @transform_1, window_bounds = array<i64: 128, 128>}, {pipeline_mode = #tpu.pipeline_mode<synchronous>, transform_indices = @transform_2, window_bounds = array<i64: 1, 128>}, {pipeline_mode = #tpu.pipeline_mode<synchronous>, transform_indices = @transform_3, window_bounds = array<i64: 128, 128>}, {pipeline_mode = #tpu.pipeline_mode<synchronous>, transform_indices = @transform_4, window_bounds = array<i64: 1, 128>}, {pipeline_mode = #tpu.pipeline_mode<synchronous>, transform_indices = @transform_5, window_bounds = array<i64: 128, 128>}, {pipeline_mode = #tpu.pipeline_mode<synchronous>, transform_indices = @transform_6, window_bounds = array<i64: 1, 128>}, {transform_indices = @transform_7, window_bounds = array<i64: 8, 128>}]} {
    %c0 = arith.constant 0 : index
    %c0_0 = arith.constant 0 : index
    %0 = vector.load %arg1[%c0, %c0_0] : memref<8x128xbf16, #tpu.memory_space<vmem>>, vector<8x128xbf16>
    %c0_1 = arith.constant 0 : index
    %c0_2 = arith.constant 0 : index
    %1 = vector.load %arg2[%c0_1, %c0_2] : memref<128x128xbf16, #tpu.memory_space<vmem>>, vector<128x128xbf16>
    %cst = arith.constant dense<0.000000e+00> : vector<8x128xf32>
    %2 = tpu.matmul %0, %1, %cst {dimension_numbers = #tpu.dot_dimension_numbers<[1], [0], [0], [1], [0, 0, 1, 1], [], []>} : vector<8x128xbf16>, vector<128x128xbf16>, vector<8x128xf32> -> vector<8x128xf32>
    %c0_3 = arith.constant 0 : index
    %c0_4 = arith.constant 0 : index
    %3 = vector.load %arg3[%c0_3, %c0_4] : memref<1x128xf32, #tpu.memory_space<vmem>>, vector<1x128xf32>
    %4 = vector.broadcast %3 : vector<1x128xf32> to vector<8x128xf32>
    %5 = arith.addf %2, %4 : vector<8x128xf32>
    %cst_5 = arith.constant 0.000000e+00 : f32
    %6 = vector.broadcast %cst_5 : f32 to vector<8x128xf32>
    %7 = arith.maximumf %5, %6 : vector<8x128xf32>
    %8 = arith.truncf %7 : vector<8x128xf32> to vector<8x128xbf16>
    %c0_6 = arith.constant 0 : index
    %c0_7 = arith.constant 0 : index
    %9 = vector.load %arg4[%c0_6, %c0_7] : memref<128x128xbf16, #tpu.memory_space<vmem>>, vector<128x128xbf16>
    %cst_8 = arith.constant dense<0.000000e+00> : vector<8x128xf32>
    %10 = tpu.matmul %8, %9, %cst_8 {dimension_numbers = #tpu.dot_dimension_numbers<[1], [0], [0], [1], [0, 0, 1, 1], [], []>} : vector<8x128xbf16>, vector<128x128xbf16>, vector<8x128xf32> -> vector<8x128xf32>
    %c0_9 = arith.constant 0 : index
    %c0_10 = arith.constant 0 : index
    %11 = vector.load %arg5[%c0_9, %c0_10] : memref<1x128xf32, #tpu.memory_space<vmem>>, vector<1x128xf32>
    %12 = vector.broadcast %11 : vector<1x128xf32> to vector<8x128xf32>
    %13 = arith.addf %10, %12 : vector<8x128xf32>
    %cst_11 = arith.constant 0.000000e+00 : f32
    %14 = vector.broadcast %cst_11 : f32 to vector<8x128xf32>
    %15 = arith.maximumf %13, %14 : vector<8x128xf32>
    %16 = arith.truncf %15 : vector<8x128xf32> to vector<8x128xbf16>
    %c0_12 = arith.constant 0 : index
    %c0_13 = arith.constant 0 : index
    %17 = vector.load %arg6[%c0_12, %c0_13] : memref<128x128xbf16, #tpu.memory_space<vmem>>, vector<128x128xbf16>
    %cst_14 = arith.constant dense<0.000000e+00> : vector<8x128xf32>
    %18 = tpu.matmul %16, %17, %cst_14 {dimension_numbers = #tpu.dot_dimension_numbers<[1], [0], [0], [1], [0, 0, 1, 1], [], []>} : vector<8x128xbf16>, vector<128x128xbf16>, vector<8x128xf32> -> vector<8x128xf32>
    %c0_15 = arith.constant 0 : index
    %c0_16 = arith.constant 0 : index
    %19 = vector.load %arg7[%c0_15, %c0_16] : memref<1x128xf32, #tpu.memory_space<vmem>>, vector<1x128xf32>
    %20 = vector.broadcast %19 : vector<1x128xf32> to vector<8x128xf32>
    %21 = arith.addf %18, %20 : vector<8x128xf32>
    %22 = math.tanh %21 : vector<8x128xf32>
    %c0_17 = arith.constant 0 : index
    %c0_18 = arith.constant 0 : index
    %23 = vector.load %arg8[%c0_17, %c0_18] : memref<8x128xf32, #tpu.memory_space<vmem>>, vector<8x128xf32>
    tpu.vector_store %arg8[%c0_17, %c0_18], %22 {strides = array<i32>} : memref<8x128xf32, #tpu.memory_space<vmem>>, vector<8x128xf32>,
    return
  }
  func.func @transform_0(%arg0: i32) -> (i32, i32) {
    %c0_i32 = arith.constant 0 : i32
    %c0_i32_0 = arith.constant 0 : i32
    return %arg0, %c0_i32 : i32, i32
  }
  func.func @transform_1(%arg0: i32) -> (i32, i32) {
    %c0_i32 = arith.constant 0 : i32
    %c0_i32_0 = arith.constant 0 : i32
    %c0_i32_1 = arith.constant 0 : i32
    return %c0_i32, %c0_i32_0 : i32, i32
  }
  func.func @transform_2(%arg0: i32) -> (i32, i32) {
    %c0_i32 = arith.constant 0 : i32
    %c0_i32_0 = arith.constant 0 : i32
    %c0_i32_1 = arith.constant 0 : i32
    return %c0_i32, %c0_i32_0 : i32, i32
  }
  func.func @transform_3(%arg0: i32) -> (i32, i32) {
    %c0_i32 = arith.constant 0 : i32
    %c0_i32_0 = arith.constant 0 : i32
    %c0_i32_1 = arith.constant 0 : i32
    return %c0_i32, %c0_i32_0 : i32, i32
  }
  func.func @transform_4(%arg0: i32) -> (i32, i32) {
    %c0_i32 = arith.constant 0 : i32
    %c0_i32_0 = arith.constant 0 : i32
    %c0_i32_1 = arith.constant 0 : i32
    return %c0_i32, %c0_i32_0 : i32, i32
  }
  func.func @transform_5(%arg0: i32) -> (i32, i32) {
    %c0_i32 = arith.constant 0 : i32
    %c0_i32_0 = arith.constant 0 : i32
    %c0_i32_1 = arith.constant 0 : i32
    return %c0_i32, %c0_i32_0 : i32, i32
  }
  func.func @transform_6(%arg0: i32) -> (i32, i32) {
    %c0_i32 = arith.constant 0 : i32
    %c0_i32_0 = arith.constant 0 : i32
    %c0_i32_1 = arith.constant 0 : i32
    return %c0_i32, %c0_i32_0 : i32, i32
  }
  func.func @transform_7(%arg0: i32) -> (i32, i32) {
    %c0_i32 = arith.constant 0 : i32
    %c0_i32_0 = arith.constant 0 : i32
    return %arg0, %c0_i32 : i32, i32
  }
}

</mosaic_0001>

<bundles_post_ra>
// kernel: tpu_custom_call.1
= control target key start
LH: loop header
LB: loop body
LE: loop exit
PB: predicated region body
PF: predicated region fallthrough
CT: control target
= control target key end

     0   :  { %12 = vsyncpa [#allocation3], 0  ;;  %s807_s0 = inlined_call_operand.hbm [shape: bf16[8,128], index: 0, kind: input, shape index: {}]   ;;  %s808_s1 = inlined_call_operand.hbm [shape: bf16[128,128], index: 1, kind: input, shape index: {}]   ;;  %s809_s2 = inlined_call_operand.vmem [shape: f32[1,128], index: 2, kind: input, shape index: {}]   ;;  %s810_s3 = inlined_call_operand.hbm [shape: bf16[128,128], index: 3, kind: input, shape index: {}]   ;;  %s811_s4 = inlined_call_operand.vmem [shape: f32[1,128], index: 4, kind: input, shape index: {}]   ;;  %s812_s5 = inlined_call_operand.hbm [shape: bf16[128,128], index: 5, kind: input, shape index: {}]   ;;  %s813_s6 = inlined_call_operand.vmem [shape: f32[1,128], index: 6, kind: input, shape index: {}]   ;;  %s814_s7 = inlined_call_operand.hbm [shape: f32[8,128], index: 7, kind: output, shape index: {}]  }
   0x1   :  { %13 = vsyncpa [#allocation6], 0 }
   0x2   :  { %14 = vsyncpa [#allocation9], 0 }
   0x3   :  { %15 = vsyncpa [#allocation4], 0  ;;  %s695_s24 = smov [#allocation5]  }
   0x4   :  { %s31_s25 = sshll.u32 %s695_s24, 4  ;;  %s32_s25 = int_to_ptr.vmem [resolvable:$true] %s31_s25 }
   0x5   :  { %s595_s26 = scalar_lea.vmem %s32_s25, 1024  ;;  %p600_p1 = scmp.lt.s32.totalorder %s32_s25, %s32_s25 }
   0x6   :  { %p596_p0 = scmp.ne.s32.totalorder %s32_s25, %s595_s26  ;;  %p601_p2 = scmp.lt.s32.totalorder %s595_s26, %s595_s26 }
   0x8   :  { %p602_p3 = por %p601_p2, %p600_p1 }
   0xa   :  { %p603_p4 = pnand %p602_p3, %p596_p0 }
   0xc   :  { %606 = shalt.err (!%p603_p4)
}
   0xd   :  { %s696_s27 = smov 64   ;;  %s697_s28 = smov 4  }
   0xe   :  { %37 = dma.hbm_to_vmem [thread:$0]  %s808_s1, 1024, %s32_s25, [#allocation6], %s696_s27, %s696_s27, %s697_s28  }
   0xf   :  { %s698_s8 = smov [#allocation2]   ;;  %s699_s10 = smov [#allocation7]  }
  0x10   :  { %s22_s9 = sshll.u32 %s698_s8, 4  ;;  %s45_s11 = sshll.u32 %s699_s10, 4  ;;  %s23_s9 = int_to_ptr.vmem [resolvable:$true] %s22_s9  ;;  %s46_s11 = int_to_ptr.vmem [resolvable:$true] %s45_s11 }
  0x11   :  { %s615_s12 = scalar_lea.vmem %s23_s9, 64  ;;  %p620_p6 = scmp.lt.s32.totalorder %s23_s9, %s23_s9 }
  0x12   :  { %p616_p5 = scmp.ne.s32.totalorder %s23_s9, %s615_s12  ;;  %p621_p7 = scmp.lt.s32.totalorder %s615_s12, %s615_s12 }
  0x14   :  { %p622_p8 = por %p621_p7, %p620_p6 }
  0x16   :  { %p623_p9 = pnand %p622_p8, %p616_p5 }
  0x18   :  { %626 = shalt.err (!%p623_p9)
}
  0x19   :  { %25 = dma.hbm_to_vmem [thread:$0]  %s807_s0, 64, %s23_s9, [#allocation3]  }
  0x1a   :  { %s635_s15 = scalar_lea.vmem %s46_s11, 1024  ;;  %p640_p11 = scmp.lt.s32.totalorder %s46_s11, %s46_s11 }
  0x1b   :  { %p636_p10 = scmp.ne.s32.totalorder %s46_s11, %s635_s15  ;;  %p641_p12 = scmp.lt.s32.totalorder %s635_s15, %s635_s15 }
  0x1d   :  { %p642_p13 = por %p641_p12, %p640_p11 }
  0x1f   :  { %p643_p0 = pnand %p642_p13, %p636_p10 }
  0x21   :  { %646 = shalt.err (!%p643_p0)
}
  0x22   :  { %51 = dma.hbm_to_vmem [thread:$0]  %s810_s3, 1024, %s46_s11, [#allocation6], %s696_s27, %s696_s27, %s697_s28  }
  0x23   :  { %s700_s17 = smov [#allocation8]  }
  0x24   :  { %s59_s18 = sshll.u32 %s700_s17, 4  ;;  %s60_s18 = int_to_ptr.vmem [resolvable:$true] %s59_s18 }
  0x25   :  { %s655_s19 = scalar_lea.vmem %s60_s18, 1024  ;;  %p660_p2 = scmp.lt.s32.totalorder %s60_s18, %s60_s18 }
  0x26   :  { %p656_p1 = scmp.ne.s32.totalorder %s60_s18, %s655_s19  ;;  %p661_p3 = scmp.lt.s32.totalorder %s655_s19, %s655_s19 }
  0x28   :  { %p662_p4 = por %p661_p3, %p660_p2 }
  0x2a   :  { %p663_p5 = pnand %p662_p4, %p656_p1 }
  0x2c   :  { %666 = shalt.err (!%p663_p5)
}
  0x2d   :  { %65 = dma.hbm_to_vmem [thread:$0]  %s812_s5, 1024, %s60_s18, [#allocation9], %s696_s27, %s696_s27, %s697_s28  }
  0x2e   :  { %687 = dma.done.wait [#allocation3], 64  }
  0x2f   :  { %688 = vsyncadd [#allocation3], 4294967232 }
  0x30   :  { %689 = dma.done.wait [#allocation6], 2048  }
  0x31   :  { %690 = vsyncadd [#allocation6], 4294965248 }
  0x32   :  { %691 = dma.done.wait [#allocation9], 1024  }
  0x33   :  { %692 = vsyncadd [#allocation9], 4294966272  ;;  %v701_v0 = vmov 0.0   ;;  %vm702_vm0 = vmmov 0   ;;  %v561_v1 = vld [vmem:[#allocation5 + $0x38] sm:$0xff]   ;;  %v562_v2 = vld [vmem:[#allocation5 + $0x30] sm:$0xff]  }
  0x34   :  { %492 = vmatprep.subr.bf16.mxu0 %v701_v0  ;;  %508 = vmatprep.mubr.msk.bf16.mxu0 %vm702_vm0, %v701_v0  ;;  %v563_v3 = vld [vmem:[#allocation5 + $0x28] sm:$0xff]   ;;  %v569_v4 = vld [vmem:[#allocation7 + $0x38] sm:$0xff]   ;;  %v564_v5 = vld [vmem:[#allocation5 + $0x20] sm:$0xff]   ;;  %s703_s24 = smov [#allocation10]  }
  0x35   :  { %512 = vmatprep.subr.bf16.mxu1 %v701_v0  ;;  %528 = vmatprep.mubr.msk.bf16.mxu1 %vm702_vm0, %v701_v0  ;;  %v570_v6 = vld [vmem:[#allocation7 + $0x30] sm:$0xff]   ;;  %v565_v7 = vld [vmem:[#allocation5 + $0x18] sm:$0xff]   ;;  %v571_v8 = vld [vmem:[#allocation7 + $0x28] sm:$0xff]  }
  0x36   :  { %493 = vmatpush3.bf16.msra.mxu0 %v561_v1  ;;  %513 = vmatpush3.bf16.msra.mxu1 %v569_v4  ;;  %v566_v9 = vld [vmem:[#allocation5 + $0x10] sm:$0xff]   ;;  %v572_v10 = vld [vmem:[#allocation7 + $0x20] sm:$0xff]   ;;  %v567_v11 = vld [vmem:[#allocation5 + $0x8] sm:$0xff]  }
  0x37   :  { %494 = vmatprep.subr.bf16.mxu0 %v701_v0  ;;  %514 = vmatprep.subr.bf16.mxu1 %v701_v0  ;;  %v573_v12 = vld [vmem:[#allocation7 + $0x18] sm:$0xff]   ;;  %v568_v13 = vld [vmem:[#allocation5] sm:$0xff]   ;;  %v574_v14 = vld [vmem:[#allocation7 + $0x10] sm:$0xff]  }
  0x38   :  { %v81_v15 = vld [vmem:[#allocation2] sm:$0xf]  ;;  %v575_v16 = vld [vmem:[#allocation7 + $0x8] sm:$0xff]   ;;  %v576_v17 = vld [vmem:[#allocation7] sm:$0xff]  }
  0x39   :  { %v577_v18 = vld [vmem:[#allocation8 + $0x38] sm:$0xff]   ;;  %v578_v19 = vld [vmem:[#allocation8 + $0x30] sm:$0xff]   ;;  %v579_v20 = vld [vmem:[#allocation8 + $0x28] sm:$0xff]  }
  0x3a   :  { %495 = vmatpush3.bf16.msra.mxu0 %v562_v2  ;;  %515 = vmatpush3.bf16.msra.mxu1 %v570_v6  ;;  %v580_v21 = vld [vmem:[#allocation8 + $0x20] sm:$0xff]   ;;  %v581_v22 = vld [vmem:[#allocation8 + $0x18] sm:$0xff]   ;;  %v582_v23 = vld [vmem:[#allocation8 + $0x10] sm:$0xff]  }
  0x3b   :  { %496 = vmatprep.subr.bf16.mxu0 %v701_v0  ;;  %516 = vmatprep.subr.bf16.mxu1 %v701_v0  ;;  %v438_v24 = vld [vmem:[%s809_s2] ss:$0 sm:$0xff]  ;;  %v583_v32 = vld [vmem:[#allocation8 + $0x8] sm:$0xff]   ;;  %v584_v33 = vld [vmem:[#allocation8] sm:$0xff]  }
  0x3c   :  { %v447_v34 = vld [vmem:[%s811_s4] ss:$0 sm:$0xff]  ;;  %s427_s4 = sshll.u32 %s703_s24, 4  ;;  %s428_s4 = int_to_ptr.vmem [resolvable:$true] %s427_s4 }
  0x3d   :  { %v456_v42 = vld [vmem:[%s813_s6] ss:$0 sm:$0xff]  ;;  %s667_s25 = scalar_lea.vmem %s428_s4, 128  ;;  %p672_p7 = scmp.lt.s32.totalorder %s428_s4, %s428_s4 }
  0x3e   :  { %497 = vmatpush3.bf16.msra.mxu0 %v563_v3  ;;  %517 = vmatpush3.bf16.msra.mxu1 %v571_v8  ;;  %p668_p6 = scmp.ne.s32.totalorder %s428_s4, %s667_s25  ;;  %p673_p8 = scmp.lt.s32.totalorder %s667_s25, %s667_s25 }
  0x3f   :  { %498 = vmatprep.subr.bf16.mxu0 %v701_v0  ;;  %518 = vmatprep.subr.bf16.mxu1 %v701_v0 }
  0x40   :  { %p674_p9 = por %p673_p8, %p672_p7 }
  0x42   :  { %499 = vmatpush3.bf16.msra.mxu0 %v564_v5  ;;  %519 = vmatpush3.bf16.msra.mxu1 %v572_v10  ;;  %p675_p10 = pnand %p674_p9, %p668_p6 }
  0x43   :  { %500 = vmatprep.subr.bf16.mxu0 %v701_v0  ;;  %520 = vmatprep.subr.bf16.mxu1 %v701_v0 }
  0x46   :  { %501 = vmatpush3.bf16.msra.mxu0 %v565_v7  ;;  %521 = vmatpush3.bf16.msra.mxu1 %v573_v12 }
  0x47   :  { %502 = vmatprep.subr.bf16.mxu0 %v701_v0  ;;  %522 = vmatprep.subr.bf16.mxu1 %v701_v0 }
  0x4a   :  { %503 = vmatpush3.bf16.msra.mxu0 %v566_v9  ;;  %523 = vmatpush3.bf16.msra.mxu1 %v574_v14 }
  0x4b   :  { %504 = vmatprep.subr.bf16.mxu0 %v701_v0  ;;  %524 = vmatprep.subr.bf16.mxu1 %v701_v0 }
  0x4e   :  { %505 = vmatpush3.bf16.msra.mxu0 %v567_v11  ;;  %525 = vmatpush3.bf16.msra.mxu1 %v575_v16 }
  0x4f   :  { %506 = vmatprep.subr.bf16.mxu0 %v701_v0  ;;  %526 = vmatprep.subr.bf16.mxu1 %v701_v0 }
  0x52   :  { %507 = vmatpush3.bf16.msra.mxu0 %v568_v13  ;;  %527 = vmatpush3.bf16.msra.mxu1 %v576_v17 }
  0x53   :  { %532 = vmatprep.subr.bf16.mxu0 %v701_v0 }
  0x55   :  { %509 = vmatmul.mubr.bf16.vlgmr.msra.gmra.mxu0 %v81_v15 }
  0x56   :  { %548 = vmatprep.mubr.msk.bf16.mxu0 %vm702_vm0, %v701_v0  ;;  %533 = vmatpush3.bf16.msra.mxu0 %v577_v18 }
  0x57   :  { %534 = vmatprep.subr.bf16.mxu0 %v701_v0 }
  0x5a   :  { %535 = vmatpush3.bf16.msra.mxu0 %v578_v19 }
  0x5b   :  { %536 = vmatprep.subr.bf16.mxu0 %v701_v0 }
  0x5e   :  { %537 = vmatpush3.bf16.msra.mxu0 %v579_v20 }
  0x5f   :  { %538 = vmatprep.subr.bf16.mxu0 %v701_v0 }
  0x62   :  { %539 = vmatpush3.bf16.msra.mxu0 %v580_v21 }
  0x63   :  { %540 = vmatprep.subr.bf16.mxu0 %v701_v0 }
  0x66   :  { %541 = vmatpush3.bf16.msra.mxu0 %v581_v22 }
  0x67   :  { %542 = vmatprep.subr.bf16.mxu0 %v701_v0 }
  0x6a   :  { %543 = vmatpush3.bf16.msra.mxu0 %v582_v23 }
  0x6b   :  { %544 = vmatprep.subr.bf16.mxu0 %v701_v0 }
  0x6e   :  { %545 = vmatpush3.bf16.msra.mxu0 %v583_v32 }
  0x6f   :  { %546 = vmatprep.subr.bf16.mxu0 %v701_v0 }
  0x72   :  { %547 = vmatpush3.bf16.msra.mxu0 %v584_v33 }
 0x115   :  { %v187_v25 = vpop.f32.mrf.mxu0 }
 0x116   :  { %v188_v26 = vadd.f32 %v438_v24, %v187_v25 }
 0x117   :  { %v510_v27 = vpop.f32.mrf.mxu0 }
 0x118   :  { %v193_v28 = vmax.f32 %v188_v26, 0.0 }
 0x119   :  { %v190_v29 = vpop.f32.mrf.mxu0 }
 0x11a   :  { %v194_v30 = vpack.c.bf16 %v193_v28, %v193_v28 }
 0x11b   :  { %v511_v31 = vpop.f32.mrf.mxu0 }
 0x11c   :  { %529 = vmatmul.mubr.bf16.vlgmr.msra.gmra.mxu1 %v194_v30 }
 0x1dc   :  { %v300_v35 = vpop.f32.mrf.mxu1 }
 0x1dd   :  { %v301_v36 = vadd.f32 %v447_v34, %v300_v35 }
 0x1de   :  { %v530_v37 = vpop.f32.mrf.mxu1 }
 0x1df   :  { %v306_v38 = vmax.f32 %v301_v36, 0.0 }
 0x1e0   :  { %v303_v39 = vpop.f32.mrf.mxu1 }
 0x1e1   :  { %v307_v40 = vpack.c.bf16 %v306_v38, %v306_v38 }
 0x1e2   :  { %v531_v41 = vpop.f32.mrf.mxu1 }
 0x1e3   :  { %549 = vmatmul.mubr.bf16.vlgmr.msra.gmra.mxu0 %v307_v40 }
 0x2a3   :  { %v413_v43 = vpop.f32.mrf.mxu0 }
 0x2a4   :  { %v414_v44 = vadd.f32 %v456_v42, %v413_v43 }
 0x2a5   :  { %v550_v45 = vpop.f32.mrf.mxu0 }
 0x2a6   :  { %585 = vtanh.f32 %v414_v44 }
 0x2a7   :  { %v416_v46 = vpop.f32.mrf.mxu0 }
 0x2a9   :  { %v551_v47 = vpop.f32.mrf.mxu0 }
 0x2b3   :  { %v586_v48 = vpop.eup %585 }
 0x2b4   :  { %420 = vst [vmem:[#allocation10] sm:$0xff] %v586_v48 }
 0x2b5   :  { %678 = shalt.err (!%p675_p10)
}
 0x2b6   :  { %430 = dma.vmem_to_hbm [thread:$0]  %s428_s4, 128, %s814_s7, [#allocation4]  }
 0x2b7   :  { %693 = dma.done.wait [#allocation4], 128  }
 0x2b8   :  { %694 = vsyncadd [#allocation4], 4294967168 }
 0x2b9   :  { %434 = vsyncpa [#allocation3], 1 }
 0x2ba   :  { %435 = vsyncpa [#allocation6], 1 }
 0x2bb   :  { %436 = vsyncpa [#allocation9], 1 }
 0x2bc   :  { %437 = vsyncpa [#allocation4], 1 }

</bundles_post_ra>
